<compile_context>
chip_gen: v6e
topology: v6e:2x2x1
jax: 0.10.0
libtpu: 0.0.40
codegen_flags: <defaults>
</compile_context>

<pallas_src>
import jax
import jax.numpy as jnp
from jax import lax
from jax.experimental import pallas as pl
from jax.experimental.pallas import tpu as pltpu

NUM_CLASSES = 19
IGNORE_INDEX = 255
EPSILON = 1e-6


def _round_up(x, m):
    return ((x + m - 1) // m) * m


def _make_mean_dice_kernel(num_classes, ignore_index, hw_total, tile_hw,
                           fold_width, num_splits, compute_dtype):
    # Ragged-tile masking only needed if the spatial extent is not a tile multiple.
    need_pad_mask = (hw_total % tile_hw) != 0
    # ignore_index=255 >= num_classes, so (cls_id == target) is already False for
    # ignored pixels; an explicit valid mask is only load-bearing if ignore_index
    # ever lands inside [0, num_classes).
    need_valid_mask = ignore_index < num_classes
    n_chunks = tile_hw // fold_width

    def lane_fold(x):
        """(C, tile) -> (C, fold_width) f32 partial lane-sums.

        Static 128-aligned lane slices + VALU adds only; the final cross-lane
        (XLU) reduce is deferred to the finalize block.  The per-chunk astype
        keeps the accumulation in f32 even when the elementwise stage is bf16.
        """
        r = x[:, 0:fold_width].astype(jnp.float32)
        for k in range(1, n_chunks):
            r = r + x[:, k * fold_width:(k + 1) * fold_width].astype(jnp.float32)
        return r

    def kernel(pred_ref, target_ref, out_ref, acc_i_ref, acc_p_ref, acc_t_ref):
        # pred_ref:   (C, tile_hw)   logits (input dtype) for one batch element
        # target_ref: (1, tile_hw)   integer labels
        # out_ref:    (C, 3)         [intersection, pred_sum, target_sum]
        # acc_*_ref:  (C, fold_width) f32 lane-wide accumulators across tiles
        s = pl.program_id(1)
        t = pl.program_id(2)

        @pl.when(t == 0)
        def _init():
            acc_i_ref[...] = jnp.zeros_like(acc_i_ref)
            acc_p_ref[...] = jnp.zeros_like(acc_p_ref)
            acc_t_ref[...] = jnp.zeros_like(acc_t_ref)

        pred = pred_ref[...]
        if pred.dtype != compute_dtype:
            pred = pred.astype(compute_dtype)          # (C, tile)
        tgt = target_ref[...]
        if tgt.dtype != jnp.int32:
            tgt = tgt.astype(jnp.int32)                # (1, tile)

        # Softmax over the class (sublane) axis, in compute_dtype.
        m = jnp.max(pred, axis=0, keepdims=True)       # (1, tile)
        e = jnp.exp(pred - m)                          # (C, tile)
        denom = jnp.sum(e, axis=0, keepdims=True)      # (1, tile)
        inv = pl.reciprocal(denom.astype(jnp.float32), approx=True)
        p = e * inv.astype(compute_dtype)              # (C, tile)

        # On-the-fly one-hot: (C, 1) class-id column broadcast vs labels.
        cls_ids = lax.broadcasted_iota(jnp.int32, (num_classes, 1), 0)
        eq = cls_ids == tgt                            # (C, tile) bool
        if need_valid_mask:
            eq = jnp.logical_and(eq, tgt != ignore_index)

        def accumulate(p_m, eq_m):
            zero = jnp.zeros((), p_m.dtype)
            acc_i_ref[...] += lane_fold(jnp.where(eq_m, p_m, zero))
            acc_p_ref[...] += lane_fold(p_m)
            acc_t_ref[...] += lane_fold(eq_m)

        if need_pad_mask:
            # Only the globally-last tile is ragged; every other step takes the
            # mask-free branch (no iota / no extra selects on the hot path).
            rem = hw_total % tile_hw
            is_ragged = jnp.logical_and(s == num_splits - 1,
                                        t == pl.num_programs(2) - 1)

            @pl.when(jnp.logical_not(is_ragged))
            def _full():
                accumulate(p, eq)

            @pl.when(is_ragged)
            def _ragged():
                # Out-of-range lanes of an unpadded ragged block hold garbage
                # (possibly NaN logits / arbitrary labels): mask BOTH the
                # softmax contributions and the one-hot compare.
                col = lax.broadcasted_iota(jnp.int32, (1, tile_hw), 1)
                lane_ok = col < rem
                accumulate(jnp.where(lane_ok, p, jnp.zeros((), p.dtype)),
                           jnp.logical_and(eq, lane_ok))
        else:
            accumulate(p, eq)

        @pl.when(t == pl.num_programs(2) - 1)
        def _finalize():
            out_ref[:, 0:1] = jnp.sum(acc_i_ref[...], axis=1, keepdims=True)
            out_ref[:, 1:2] = jnp.sum(acc_p_ref[...], axis=1, keepdims=True)
            out_ref[:, 2:3] = jnp.sum(acc_t_ref[...], axis=1, keepdims=True)

    return kernel


def mean_dice(pred, target, num_classes=NUM_CLASSES, ignore_index=IGNORE_INDEX,
              epsilon=EPSILON, tile_hw=32768, core_splits=None,
              compute_dtype=None, label_dtype=jnp.int32, vmem_limit_bytes=None):
    """pred: (N, C, H, W) float logits (f32 or bf16); target: (N, H, W) int labels.

    tile_hw: spatial lanes per grid step (default 32768; clipped to the image).
    core_splits: split the tile loop across an extra parallel grid axis so both
        v7x TensorCores are busy when N is small (auto: 2 when N == 1).
    compute_dtype: elementwise softmax dtype (auto: bf16 for bf16 inputs,
        else f32).  On v5e pass jnp.float32 explicitly for bf16 inputs.
    label_dtype: HBM storage dtype for labels (jnp.uint8 shrinks the label
        stream on HBM-bound v5e; default int32 for the safest lowering).
    """
    N, C, H, W = pred.shape
    assert C == num_classes
    HW = H * W

    # Tile size: biggest lane tile that fits, aligned so the in-kernel lane
    # fold uses clean 128-aligned chunks (>= 1024-wide chunks for big tiles).
    tile_hw = min(_round_up(int(tile_hw), 128), _round_up(HW, 128))
    if tile_hw >= 1024:
        tile_hw = min(_round_up(tile_hw, 1024), _round_up(HW, 1024))
    fold_width = min(1024, tile_hw)
    num_tiles = pl.cdiv(HW, tile_hw)

    if core_splits is None:
        core_splits = 2 if N == 1 else 1
    # Splits must divide the tile count so only the globally-last tile is ragged.
    splits = core_splits if (core_splits > 1 and num_tiles % core_splits == 0) else 1
    tiles_per_split = num_tiles // splits

    # No host-side padding of the logits (a jnp.pad would materialize a second
    # full copy of pred in HBM); the ragged last tile is masked in-kernel.
    pred_flat = pred.reshape(N, C, HW)
    target_flat = target.reshape(N, 1, HW)
    if target_flat.dtype != label_dtype:
        target_flat = target_flat.astype(label_dtype)

    if compute_dtype is None:
        compute_dtype = jnp.bfloat16 if pred.dtype == jnp.bfloat16 else jnp.float32

    if vmem_limit_bytes is None:
        itemsize = jnp.dtype(pred.dtype).itemsize
        pred_block = C * tile_hw * itemsize            # one input buffer
        f32_tile = C * tile_hw * 4                     # one f32 temporary
        est = 2 * pred_block + 2 * tile_hw * 4 + 8 * f32_tile + (4 << 20)
        vmem_limit_bytes = int(min(max(est, 32 << 20), 64 << 20))

    kernel = _make_mean_dice_kernel(num_classes, ignore_index, HW, tile_hw,
                                    fold_width, splits, compute_dtype)

    def hw_map(n, s, t):
        return (n, 0, s * tiles_per_split + t)

    stats = pl.pallas_call(
        kernel,
        out_shape=jax.ShapeDtypeStruct((N, splits, num_classes, 3), jnp.float32),
        grid_spec=pltpu.PrefetchScalarGridSpec(
            num_scalar_prefetch=0,
            grid=(N, splits, tiles_per_split),
            in_specs=[
                # TODO(synk): on v5e, pipeline_mode=pl.Buffered(3) here if
                # profiling shows exposed DMA on the pred stream.
                pl.BlockSpec((None, num_classes, tile_hw), hw_map),
                pl.BlockSpec((None, 1, tile_hw), hw_map),
            ],
            out_specs=pl.BlockSpec((None, None, num_classes, 3),
                                   lambda n, s, t: (n, s, 0, 0)),
            scratch_shapes=[pltpu.VMEM((num_classes, fold_width), jnp.float32)] * 3,
        ),
        compiler_params=pltpu.CompilerParams(
            dimension_semantics=("parallel", "parallel", "arbitrary"),
            vmem_limit_bytes=vmem_limit_bytes,
        ),
    )(pred_flat, target_flat)

    stats = stats.sum(axis=1)                          # (N, C, 3) over splits
    intersection = stats[:, :, 0]
    union = stats[:, :, 1] + stats[:, :, 2]
    dice_score = (2.0 * intersection + epsilon) / (union + epsilon)
    return 1.0 - jnp.mean(dice_score)


def mean_dice_ref(pred, target, num_classes=NUM_CLASSES,
                  ignore_index=IGNORE_INDEX, epsilon=EPSILON):
    """Pure-JAX reference mirroring the PyTorch module."""
    p = jax.nn.softmax(pred.astype(jnp.float32), axis=1)
    valid = target != ignore_index
    tgt = jnp.where(valid, target, 0)
    onehot = jax.nn.one_hot(tgt, num_classes, axis=1, dtype=jnp.float32)
    onehot = onehot * valid[:, None, :, :].astype(jnp.float32)
    inter = jnp.sum(p * onehot, axis=(2, 3))
    union = jnp.sum(p, axis=(2, 3)) + jnp.sum(onehot, axis=(2, 3))
    dice = (2.0 * inter + epsilon) / (union + epsilon)
    return 1.0 - jnp.mean(dice)


if __name__ == "__main__":
    key = jax.random.PRNGKey(0)
    k1, k2, k3 = jax.random.split(key, 3)

    # Small shapes chosen so the unpadded ragged-tile path is exercised:
    # HW = 32*30 = 960, tile_hw=256 -> 4 tiles, last one ragged (192 valid lanes).
    N, C, H, W = 2, NUM_CLASSES, 32, 30
    pred = jax.random.normal(k1, (N, C, H, W), dtype=jnp.float32)
    target = jax.random.randint(k2, (N, H, W), 0, C, dtype=jnp.int32)
    ignore_mask = jax.random.uniform(k3, (N, H, W)) < 0.1
    target = jnp.where(ignore_mask, IGNORE_INDEX, target)

    loss_ref = jax.block_until_ready(mean_dice_ref(pred, target))

    # Default config (single tile covering HW, ragged mask only path).
    loss_a = jax.block_until_ready(mean_dice(pred, target))
    # Multi-tile streaming path.
    loss_b = jax.block_until_ready(mean_dice(pred, target, tile_hw=256))
    # Tile loop split across a second parallel axis (v7x two-TensorCore path).
    loss_c = jax.block_until_ready(mean_dice(pred, target, tile_hw=256,
                                             core_splits=2))

    # Tolerance 2e-3: the approx (EUP) reciprocal in the softmax denominator
    # introduces up to ~1e-4 relative error per element; the dice ratio is
    # well-conditioned so the final loss stays far inside this bound.
    for loss in (loss_a, loss_b, loss_c):
        assert jnp.allclose(loss, loss_ref, atol=2e-3, rtol=2e-3), (loss, loss_ref)
    print("KERNEL_OK")
</pallas_src>

<mosaic_0001>
module attributes {stable_mosaic.version = 11 : i64} {
  func.func @kernel(%arg0: i32, %arg1: i32, %arg2: i32, %arg3: memref<1x19x1024xf32, #tpu.memory_space<vmem>>, %arg4: memref<1x1x1024xi32, #tpu.memory_space<vmem>>, %arg5: memref<1x1x19x3xf32, #tpu.memory_space<vmem>>, %arg6: memref<19x1024xf32, #tpu.memory_space<vmem>>, %arg7: memref<19x1024xf32, #tpu.memory_space<vmem>>, %arg8: memref<19x1024xf32, #tpu.memory_space<vmem>>) attributes {dimension_semantics = [#tpu.dimension_semantics<parallel>, #tpu.dimension_semantics<parallel>, #tpu.dimension_semantics<arbitrary>], iteration_bounds = array<i64: 2, 1, 1>, scalar_prefetch = 0 : i64, scratch_operands = 3 : i64, tpu.core_type = #tpu.core_type<tc>, window_params = [{transform_indices = @transform_0, window_bounds = array<i64: 1, 19, 1024>}, {transform_indices = @transform_1, window_bounds = array<i64: 1, 1, 1024>}, {transform_indices = @transform_2, window_bounds = array<i64: 1, 1, 19, 3>}]} {
    %c0_i32 = arith.constant 0 : i32
    %0 = arith.cmpi eq, %arg2, %c0_i32 : i32
    %1 = arith.extui %0 : i1 to i32
    %c0_i32_0 = arith.constant 0 : i32
    %2 = arith.cmpi ne, %1, %c0_i32_0 : i32
    scf.if %2 {
      %cst_13 = arith.constant 0.000000e+00 : f32
      %32 = vector.broadcast %cst_13 : f32 to vector<19x1024xf32>
      %c0_14 = arith.constant 0 : index
      %c0_15 = arith.constant 0 : index
      %33 = vector.load %arg6[%c0_14, %c0_15] : memref<19x1024xf32, #tpu.memory_space<vmem>>, vector<19x1024xf32>
      tpu.vector_store %arg6[%c0_14, %c0_15], %32 {strides = array<i32>} : memref<19x1024xf32, #tpu.memory_space<vmem>>, vector<19x1024xf32>,
      %cst_16 = arith.constant 0.000000e+00 : f32
      %34 = vector.broadcast %cst_16 : f32 to vector<19x1024xf32>
      %c0_17 = arith.constant 0 : index
      %c0_18 = arith.constant 0 : index
      %35 = vector.load %arg7[%c0_17, %c0_18] : memref<19x1024xf32, #tpu.memory_space<vmem>>, vector<19x1024xf32>
      tpu.vector_store %arg7[%c0_17, %c0_18], %34 {strides = array<i32>} : memref<19x1024xf32, #tpu.memory_space<vmem>>, vector<19x1024xf32>,
      %cst_19 = arith.constant 0.000000e+00 : f32
      %36 = vector.broadcast %cst_19 : f32 to vector<19x1024xf32>
      %c0_20 = arith.constant 0 : index
      %c0_21 = arith.constant 0 : index
      %37 = vector.load %arg8[%c0_20, %c0_21] : memref<19x1024xf32, #tpu.memory_space<vmem>>, vector<19x1024xf32>
      tpu.vector_store %arg8[%c0_20, %c0_21], %36 {strides = array<i32>} : memref<19x1024xf32, #tpu.memory_space<vmem>>, vector<19x1024xf32>,
    } else {
    }
    %c0 = arith.constant 0 : index
    %c0_1 = arith.constant 0 : index
    %c0_2 = arith.constant 0 : index
    %3 = vector.load %arg3[%c0, %c0_1, %c0_2] : memref<1x19x1024xf32, #tpu.memory_space<vmem>>, vector<1x19x1024xf32>
    %4 = vector.shape_cast %3 : vector<1x19x1024xf32> to vector<19x1024xf32>
    %c0_3 = arith.constant 0 : index
    %c0_4 = arith.constant 0 : index
    %c0_5 = arith.constant 0 : index
    %5 = vector.load %arg4[%c0_3, %c0_4, %c0_5] : memref<1x1x1024xi32, #tpu.memory_space<vmem>>, vector<1x1x1024xi32>
    %6 = vector.shape_cast %5 : vector<1x1x1024xi32> to vector<1x1024xi32>
    %cst = arith.constant dense<0xFF800000> : vector<1024xf32>
    %7 = vector.multi_reduction <maximumf>, %4, %cst [0] : vector<19x1024xf32> to vector<1024xf32>
    %8 = vector.shape_cast %7 : vector<1024xf32> to vector<1x1024xf32>
    %9 = vector.broadcast %8 : vector<1x1024xf32> to vector<19x1024xf32>
    %10 = arith.subf %4, %9 : vector<19x1024xf32>
    %11 = math.exp %10 : vector<19x1024xf32>
    %cst_6 = arith.constant dense<0.000000e+00> : vector<1024xf32>
    %12 = vector.multi_reduction <add>, %11, %cst_6 [0] : vector<19x1024xf32> to vector<1024xf32>
    %13 = vector.shape_cast %12 : vector<1024xf32> to vector<1x1024xf32>
    %14 = tpu.reciprocal %13 {approx = true} : vector<1x1024xf32> -> vector<1x1024xf32>
    %15 = vector.broadcast %14 : vector<1x1024xf32> to vector<19x1024xf32>
    %16 = arith.mulf %11, %15 : vector<19x1024xf32>
    %17 = tpu.iota {dimensions = array<i32: 0>} : vector<19x1xi32>
    %18 = vector.broadcast %17 : vector<19x1xi32> to vector<19x1024xi32>
    %19 = vector.broadcast %6 : vector<1x1024xi32> to vector<19x1024xi32>
    %20 = arith.cmpi eq, %18, %19 : vector<19x1024xi32>
    %c0_i32_7 = arith.constant 0 : i32
    %21 = arith.cmpi eq, %arg1, %c0_i32_7 : i32
    %c0_i32_8 = arith.constant 0 : i32
    %22 = arith.cmpi eq, %arg2, %c0_i32_8 : i32
    %23 = arith.andi %21, %22 : i1
    %true = arith.constant true
    %24 = arith.xori %23, %true : i1
    %25 = arith.extui %24 : i1 to i32
    %c0_i32_9 = arith.constant 0 : i32
    %26 = arith.cmpi ne, %25, %c0_i32_9 : i32
    scf.if %26 {
      %c0_13 = arith.constant 0 : index
      %c0_14 = arith.constant 0 : index
      %32 = vector.load %arg6[%c0_13, %c0_14] : memref<19x1024xf32, #tpu.memory_space<vmem>>, vector<19x1024xf32>
      %cst_15 = arith.constant 0.000000e+00 : f32
      %33 = vector.broadcast %cst_15 : f32 to vector<19x1024xf32>
      %34 = arith.select %20, %16, %33 : vector<19x1024xi1>, vector<19x1024xf32>
      %35 = arith.addf %32, %34 : vector<19x1024xf32>
      %c0_16 = arith.constant 0 : index
      %c0_17 = arith.constant 0 : index
      %36 = vector.load %arg6[%c0_16, %c0_17] : memref<19x1024xf32, #tpu.memory_space<vmem>>, vector<19x1024xf32>
      tpu.vector_store %arg6[%c0_16, %c0_17], %35 {strides = array<i32>} : memref<19x1024xf32, #tpu.memory_space<vmem>>, vector<19x1024xf32>,
      %c0_18 = arith.constant 0 : index
      %c0_19 = arith.constant 0 : index
      %37 = vector.load %arg7[%c0_18, %c0_19] : memref<19x1024xf32, #tpu.memory_space<vmem>>, vector<19x1024xf32>
      %38 = arith.addf %37, %16 : vector<19x1024xf32>
      %c0_20 = arith.constant 0 : index
      %c0_21 = arith.constant 0 : index
      %39 = vector.load %arg7[%c0_20, %c0_21] : memref<19x1024xf32, #tpu.memory_space<vmem>>, vector<19x1024xf32>
      tpu.vector_store %arg7[%c0_20, %c0_21], %38 {strides = array<i32>} : memref<19x1024xf32, #tpu.memory_space<vmem>>, vector<19x1024xf32>,
      %c0_22 = arith.constant 0 : index
      %c0_23 = arith.constant 0 : index
      %40 = vector.load %arg8[%c0_22, %c0_23] : memref<19x1024xf32, #tpu.memory_space<vmem>>, vector<19x1024xf32>
      %41 = arith.extui %20 : vector<19x1024xi1> to vector<19x1024xi32>
      %42 = arith.sitofp %41 : vector<19x1024xi32> to vector<19x1024xf32>
      %43 = arith.addf %40, %42 : vector<19x1024xf32>
      %c0_24 = arith.constant 0 : index
      %c0_25 = arith.constant 0 : index
      %44 = vector.load %arg8[%c0_24, %c0_25] : memref<19x1024xf32, #tpu.memory_space<vmem>>, vector<19x1024xf32>
      tpu.vector_store %arg8[%c0_24, %c0_25], %43 {strides = array<i32>} : memref<19x1024xf32, #tpu.memory_space<vmem>>, vector<19x1024xf32>,
    } else {
    }
    %27 = arith.extui %23 : i1 to i32
    %c0_i32_10 = arith.constant 0 : i32
    %28 = arith.cmpi ne, %27, %c0_i32_10 : i32
    scf.if %28 {
      %32 = tpu.iota {dimensions = array<i32: 1>} : vector<1x1024xi32>
      %c960_i32 = arith.constant 960 : i32
      %33 = vector.broadcast %c960_i32 : i32 to vector<1x1024xi32>
      %34 = arith.cmpi slt, %32, %33 : vector<1x1024xi32>
      %cst_13 = arith.constant 0.000000e+00 : f32
      %35 = vector.shape_cast %34 : vector<1x1024xi1> to vector<1x1024xi1>
      %36 = vector.broadcast %35 : vector<1x1024xi1> to vector<19x1024xi1>
      %37 = vector.broadcast %cst_13 : f32 to vector<19x1024xf32>
      %38 = arith.select %36, %16, %37 : vector<19x1024xi1>, vector<19x1024xf32>
      %39 = vector.broadcast %34 : vector<1x1024xi1> to vector<19x1024xi1>
      %40 = arith.andi %20, %39 : vector<19x1024xi1>
      %c0_14 = arith.constant 0 : index
      %c0_15 = arith.constant 0 : index
      %41 = vector.load %arg6[%c0_14, %c0_15] : memref<19x1024xf32, #tpu.memory_space<vmem>>, vector<19x1024xf32>
      %cst_16 = arith.constant 0.000000e+00 : f32
      %42 = vector.broadcast %cst_16 : f32 to vector<19x1024xf32>
      %43 = arith.select %40, %38, %42 : vector<19x1024xi1>, vector<19x1024xf32>
      %44 = arith.addf %41, %43 : vector<19x1024xf32>
      %c0_17 = arith.constant 0 : index
      %c0_18 = arith.constant 0 : index
      %45 = vector.load %arg6[%c0_17, %c0_18] : memref<19x1024xf32, #tpu.memory_space<vmem>>, vector<19x1024xf32>
      tpu.vector_store %arg6[%c0_17, %c0_18], %44 {strides = array<i32>} : memref<19x1024xf32, #tpu.memory_space<vmem>>, vector<19x1024xf32>,
      %c0_19 = arith.constant 0 : index
      %c0_20 = arith.constant 0 : index
      %46 = vector.load %arg7[%c0_19, %c0_20] : memref<19x1024xf32, #tpu.memory_space<vmem>>, vector<19x1024xf32>
      %47 = arith.addf %46, %38 : vector<19x1024xf32>
      %c0_21 = arith.constant 0 : index
      %c0_22 = arith.constant 0 : index
      %48 = vector.load %arg7[%c0_21, %c0_22] : memref<19x1024xf32, #tpu.memory_space<vmem>>, vector<19x1024xf32>
      tpu.vector_store %arg7[%c0_21, %c0_22], %47 {strides = array<i32>} : memref<19x1024xf32, #tpu.memory_space<vmem>>, vector<19x1024xf32>,
      %c0_23 = arith.constant 0 : index
      %c0_24 = arith.constant 0 : index
      %49 = vector.load %arg8[%c0_23, %c0_24] : memref<19x1024xf32, #tpu.memory_space<vmem>>, vector<19x1024xf32>
      %50 = arith.extui %40 : vector<19x1024xi1> to vector<19x1024xi32>
      %51 = arith.sitofp %50 : vector<19x1024xi32> to vector<19x1024xf32>
      %52 = arith.addf %49, %51 : vector<19x1024xf32>
      %c0_25 = arith.constant 0 : index
      %c0_26 = arith.constant 0 : index
      %53 = vector.load %arg8[%c0_25, %c0_26] : memref<19x1024xf32, #tpu.memory_space<vmem>>, vector<19x1024xf32>
      tpu.vector_store %arg8[%c0_25, %c0_26], %52 {strides = array<i32>} : memref<19x1024xf32, #tpu.memory_space<vmem>>, vector<19x1024xf32>,
    } else {
    }
    %c0_i32_11 = arith.constant 0 : i32
    %29 = arith.cmpi eq, %arg2, %c0_i32_11 : i32
    %30 = arith.extui %29 : i1 to i32
    %c0_i32_12 = arith.constant 0 : i32
    %31 = arith.cmpi ne, %30, %c0_i32_12 : i32
    scf.if %31 {
      %c0_13 = arith.constant 0 : index
      %c0_14 = arith.constant 0 : index
      %32 = vector.load %arg6[%c0_13, %c0_14] : memref<19x1024xf32, #tpu.memory_space<vmem>>, vector<19x1024xf32>
      %cst_15 = arith.constant dense<0.000000e+00> : vector<19xf32>
      %33 = vector.multi_reduction <add>, %32, %cst_15 [1] : vector<19x1024xf32> to vector<19xf32>
      %34 = vector.shape_cast %33 : vector<19xf32> to vector<19x1xf32>
      %c0_16 = arith.constant 0 : index
      %c0_17 = arith.constant 0 : index
      %c0_18 = arith.constant 0 : index
      %c0_19 = arith.constant 0 : index
      %35 = vector.load %arg5[%c0_16, %c0_17, %c0_18, %c0_19] : memref<1x1x19x3xf32, #tpu.memory_space<vmem>>, vector<1x1x19x1xf32>
      %36 = vector.shape_cast %35 : vector<1x1x19x1xf32> to vector<19x1xf32>
      %37 = vector.shape_cast %34 : vector<19x1xf32> to vector<1x1x19x1xf32>
      tpu.vector_store %arg5[%c0_16, %c0_17, %c0_18, %c0_19], %37 {strides = array<i32>} : memref<1x1x19x3xf32, #tpu.memory_space<vmem>>, vector<1x1x19x1xf32>,
      %c0_20 = arith.constant 0 : index
      %c0_21 = arith.constant 0 : index
      %38 = vector.load %arg7[%c0_20, %c0_21] : memref<19x1024xf32, #tpu.memory_space<vmem>>, vector<19x1024xf32>
      %cst_22 = arith.constant dense<0.000000e+00> : vector<19xf32>
      %39 = vector.multi_reduction <add>, %38, %cst_22 [1] : vector<19x1024xf32> to vector<19xf32>
      %40 = vector.shape_cast %39 : vector<19xf32> to vector<19x1xf32>
      %c0_23 = arith.constant 0 : index
      %c0_24 = arith.constant 0 : index
      %c0_25 = arith.constant 0 : index
      %c1 = arith.constant 1 : index
      %41 = vector.load %arg5[%c0_23, %c0_24, %c0_25, %c1] : memref<1x1x19x3xf32, #tpu.memory_space<vmem>>, vector<1x1x19x1xf32>
      %42 = vector.shape_cast %41 : vector<1x1x19x1xf32> to vector<19x1xf32>
      %43 = vector.shape_cast %40 : vector<19x1xf32> to vector<1x1x19x1xf32>
      tpu.vector_store %arg5[%c0_23, %c0_24, %c0_25, %c1], %43 {strides = array<i32>} : memref<1x1x19x3xf32, #tpu.memory_space<vmem>>, vector<1x1x19x1xf32>,
      %c0_26 = arith.constant 0 : index
      %c0_27 = arith.constant 0 : index
      %44 = vector.load %arg8[%c0_26, %c0_27] : memref<19x1024xf32, #tpu.memory_space<vmem>>, vector<19x1024xf32>
      %cst_28 = arith.constant dense<0.000000e+00> : vector<19xf32>
      %45 = vector.multi_reduction <add>, %44, %cst_28 [1] : vector<19x1024xf32> to vector<19xf32>
      %46 = vector.shape_cast %45 : vector<19xf32> to vector<19x1xf32>
      %c0_29 = arith.constant 0 : index
      %c0_30 = arith.constant 0 : index
      %c0_31 = arith.constant 0 : index
      %c2 = arith.constant 2 : index
      %47 = vector.load %arg5[%c0_29, %c0_30, %c0_31, %c2] : memref<1x1x19x3xf32, #tpu.memory_space<vmem>>, vector<1x1x19x1xf32>
      %48 = vector.shape_cast %47 : vector<1x1x19x1xf32> to vector<19x1xf32>
      %49 = vector.shape_cast %46 : vector<19x1xf32> to vector<1x1x19x1xf32>
      tpu.vector_store %arg5[%c0_29, %c0_30, %c0_31, %c2], %49 {strides = array<i32>} : memref<1x1x19x3xf32, #tpu.memory_space<vmem>>, vector<1x1x19x1xf32>,
    } else {
    }
    return
  }
  func.func @transform_0(%arg0: i32, %arg1: i32, %arg2: i32) -> (i32, i32, i32) {
    %c1_i32 = arith.constant 1 : i32
    %0 = arith.muli %arg1, %c1_i32 : i32
    %1 = arith.addi %0, %arg2 : i32
    %c0_i32 = arith.constant 0 : i32
    %c0_i32_0 = arith.constant 0 : i32
    return %arg0, %c0_i32, %1 : i32, i32, i32
  }
  func.func @transform_1(%arg0: i32, %arg1: i32, %arg2: i32) -> (i32, i32, i32) {
    %c1_i32 = arith.constant 1 : i32
    %0 = arith.muli %arg1, %c1_i32 : i32
    %1 = arith.addi %0, %arg2 : i32
    %c0_i32 = arith.constant 0 : i32
    %c0_i32_0 = arith.constant 0 : i32
    return %arg0, %c0_i32, %1 : i32, i32, i32
  }
  func.func @transform_2(%arg0: i32, %arg1: i32, %arg2: i32) -> (i32, i32, i32, i32) {
    %c0_i32 = arith.constant 0 : i32
    %c0_i32_0 = arith.constant 0 : i32
    %c0_i32_1 = arith.constant 0 : i32
    return %arg0, %arg1, %c0_i32, %c0_i32_0 : i32, i32, i32, i32
  }
}

</mosaic_0001>

<bundles_post_ra>
// kernel: tpu_custom_call.1
= control target key start
LH: loop header
LB: loop body
LE: loop exit
PB: predicated region body
PF: predicated region fallthrough
CT: control target
= control target key end

     0   :  { %s1802_s9 = smov 0   ;;  %s1804_s10 = smov 0   ;;  %s2536_s0 = inlined_call_operand.vmem [shape: f32[2,19,960], index: 0, kind: input, shape index: {}]   ;;  %s2537_s1 = inlined_call_operand.vmem [shape: s32[2,1,960], index: 1, kind: input, shape index: {}]   ;;  %s2538_s2 = inlined_call_operand.vmem [shape: f32[2,1,19,3], index: 2, kind: output, shape index: {}]  }
   0x1   :  { %s1806_s11 = smov 0  }
   0x2 LB: > { %s31_s12 = sadd.s32 1, %s1780_s10  ;;  %p1617_p0 = scmp.ge.s32.totalorder %s1784_s11, 1  ;;  %s1784_s11 = sphi %s1806_s11, %s12_s11   ;;  %s1780_s10 = sphi %s1804_s10, %s2627_s10   ;;  %s1776_s9 = sphi %s1802_s9, %s2626_s9  }
   0x3   : > { %p33_p1 = scmp.ge.s32.totalorder %s31_s12, 2  ;;  %p164_p2 = scmp.lt.s32.totalorder %s1784_s11, 3 }
   0x5   : > { %s2629_s12 = smov (%p33_p1, %s31_s12), 0  ;;  %p165_p3 = pnand %p1617_p0, %p164_p2 }
   0x7   : > { %168 = sbr.rel (%p165_p3) target bundleno = 300 (0x12c), region = 28 }
   0xc   : > { %p206_p4 = scmp.lt.s32.totalorder %s1776_s9, 1  ;;  %v586_v0 = vlaneseq  ;;  %v1786_v1 = vmov 0.0   ;;  %vm2546_vm0 = vcmask 1042432  }
   0xd   : > { %256 = vst [vmem:[#allocation2 + $0xa8] sm:$0x7] %v1786_v1  ;;  %257 = vst [vmem:[#allocation2 + $0x68] sm:$0x7] %v1786_v1 }
   0xe   : > { %258 = vst [vmem:[#allocation2 + $0x30] sm:$0x7] %v1786_v1  ;;  %259 = vst [vmem:[#allocation2 + $0x58] sm:$0x7] %v1786_v1  ;;  %s2631_s9 = smov (!%p206_p4, %s1776_s9), 1  ;;  %v1852_v2 = vshrl.u32 %v586_v0, 7 }
   0xf   : > { %260 = vst [vmem:[#allocation2 + $0x80] sm:$0x7] %v1786_v1  ;;  %261 = vst [vmem:[#allocation2 + $0xb8] sm:$0x7] %v1786_v1  ;;  %v652_v3 = vand.u32 127, %v586_v0  ;;  %s1619_s13 = sshll.u32 %s2631_s9, 3 }
  0x10   : > { %262 = vst [vmem:[#allocation2 + $0x20] sm:$0x7] %v1786_v1  ;;  %263 = vst [vmem:[#allocation2 + $0x8] sm:$0x7] %v1786_v1  ;;  %v592_v4 = vsub.s32 0, %v1852_v2  ;;  %v596_v5 = vsub.s32 1, %v1852_v2  ;;  %s224_s17 = scalar_lea.vmem %s2537_s1, %s1619_s13 }
  0x11   : > { %280 = vst [vmem:[#allocation3 + $0x58] sm:$0x7] %v1786_v1  ;;  %281 = vst [vmem:[#allocation3 + $0x38] sm:$0x7] %v1786_v1  ;;  %v600_v6 = vsub.s32 2, %v1852_v2  ;;  %v604_v7 = vsub.s32 3, %v1852_v2 }
  0x12   : > { %282 = vst [vmem:[#allocation3] sm:$0x7] %v1786_v1  ;;  %283 = vst [vmem:[#allocation3 + $0x88] sm:$0x7] %v1786_v1  ;;  %s1671_s14 = smul.u32 192, %s2631_s9  ;;  %v608_v8 = vsub.s32 4, %v1852_v2 }
  0x13   : > { %284 = vst [vmem:[#allocation3 + $0x48] sm:$0x7] %v1786_v1  ;;  %285 = vst [vmem:[#allocation3 + $0x80] sm:$0x7] %v1786_v1  ;;  %v612_v9 = vsub.s32 5, %v1852_v2  ;;  %v616_v10 = vsub.s32 6, %v1852_v2 }
  0x14   : > { %286 = vst [vmem:[#allocation3 + $0x8] sm:$0x7] %v1786_v1  ;;  %287 = vst [vmem:[#allocation3 + $0x90] sm:$0x7] %v1786_v1  ;;  %v620_v11 = vsub.s32 7, %v1852_v2  ;;  %v336_v12 = vld [vmem:[%s224_s17] sm:$0xff]  ;;  %s1880_s20 = scalar_lea.vmem %s2536_s0, %s1671_s14 }
  0x15   : > { %304 = vst [vmem:[#allocation4 + $0xb0] sm:$0x7] %v1786_v1  ;;  %305 = vst [vmem:[#allocation4 + $0x10] sm:$0x7] %v1786_v1  ;;  %v1867_v13 = vadd.s32 896, %v652_v3  ;;  %v1869_v14 = vrot.slane %v336_v12, %v592_v4  ;;  %v1871_v15 = vrot.slane %v336_v12, %v596_v5  ;;  %v1873_v16 = vrot.slane %v336_v12, %v600_v6  ;;  %v1907_v22 = vld [vmem:[%s1880_s20] sm:$0xff] }
  0x16   : > { %306 = vst [vmem:[#allocation4 + $0x68] sm:$0x7] %v1786_v1  ;;  %307 = vst [vmem:[#allocation4 + $0x30] sm:$0x7] %v1786_v1  ;;  %v1875_v17 = vrot.slane %v336_v12, %v604_v7  ;;  %v1882_v18 = vrot.slane %v336_v12, %v608_v8  ;;  %v1884_v19 = vrot.slane %v336_v12, %v612_v9  ;;  %v1923_v26 = vld [vmem:[%s1880_s20 + $0x8] sm:$0xff]  ;;  %v1926_v27 = vld [vmem:[%s1880_s20 + $0x10] sm:$0xff] }
  0x17   : > { %308 = vst [vmem:[#allocation4 + $0x50] sm:$0x7] %v1786_v1  ;;  %309 = vst [vmem:[#allocation4 + $0x60] sm:$0x7] %v1786_v1  ;;  %v1886_v20 = vrot.slane %v336_v12, %v616_v10  ;;  %v1888_v21 = vrot.slane %v336_v12, %v620_v11  ;;  %vm2545_vm1 = vcmp.eq.s32.totalorder %v1852_v2, %v1869_v14  ;;  %vm667_vm9 = vcmp.lt.s32.totalorder %v1867_v13, 960  ;;  %v1951_v33 = vld [vmem:[%s1880_s20 + $0x18] sm:$0xff] }
  0x18   : > { %310 = vst [vmem:[#allocation4 + $0x20] sm:$0x7] %v1786_v1  ;;  %311 = vst [vmem:[#allocation4 + $0x80] sm:$0x7] %v1786_v1  ;;  %vm2544_vm2 = vcmp.eq.s32.totalorder %v1852_v2, %v1871_v15  ;;  %vm2543_vm3 = vcmp.eq.s32.totalorder %v1852_v2, %v1873_v16  ;;  %vm2542_vm4 = vcmp.eq.s32.totalorder %v1852_v2, %v1875_v17  ;;  %v1621_v23 = vsel %vm2545_vm1, 1.0, %v1786_v1  ;;  %v1954_v34 = vld [vmem:[%s1880_s20 + $0x40] sm:$0xff] }
  0x19   : > { %2563 = vst [vmem:[#allocation5_spill] sm:$0xff] %v1882_v18  ;;  %2564 = vst [vmem:[#allocation6_spill] sm:$0xff] %v1884_v19  ;;  %vm2541_vm5 = vcmp.eq.s32.totalorder %v1852_v2, %v1882_v18  ;;  %vm2540_vm6 = vcmp.eq.s32.totalorder %v1852_v2, %v1884_v19  ;;  %vm2539_vm7 = vcmp.eq.s32.totalorder %v1852_v2, %v1886_v20  ;;  %v1622_v24 = vsel %vm2544_vm2, 1.0, %v1786_v1  ;;  %v1957_v35 = vld [vmem:[%s1880_s20 + $0x48] sm:$0xff]  ;;  %v1965_v37 = vld [vmem:[%s1880_s20 + $0x50] sm:$0xff]  ;;  %s1672_s21 = smul.u32 24, %s2631_s9 }
  0x1a   : > { %2565 = vst [vmem:[#allocation7_spill] sm:$0xff] %v1886_v20  ;;  %vm629_vm8 = vcmp.eq.s32.totalorder %v1852_v2, %v1888_v21  ;;  %v1623_v25 = vsel %vm2543_vm3, 1.0, %v1786_v1  ;;  %v1624_v29 = vsel %vm2542_vm4, 1.0, %v1786_v1  ;;  %v1625_v30 = vsel %vm2541_vm5, 1.0, %v1786_v1  ;;  %v1968_v38 = vld [vmem:[%s1880_s20 + $0x80] sm:$0x7] }
  0x1b   : > { %vm1930_vm10 = vmand %vm629_vm8, %vm667_vm9  ;;  %v1626_v31 = vsel %vm2540_vm6, 1.0, %v1786_v1  ;;  %v1627_v32 = vsel %vm2539_vm7, 1.0, %v1786_v1  ;;  %v1971_v39 = vld [vmem:[%s1880_s20 + $0x88] sm:$0x7]  ;;  %v1974_v40 = vld [vmem:[%s1880_s20 + $0x20] sm:$0xff]  ;;  %v1466_v43 = vadd.f32 %v1622_v24, %v1621_v23  ;;  %v337_v47 = vmax.f32 %v1907_v22, %v1954_v34  ;;  %s235_s24 = scalar_lea.vmem %s2538_s2, %s1672_s21 }
  0x1c   : > { %v1962_v36 = vsel %vm1930_vm10, 1.0, %v1786_v1  ;;  %v1977_v41 = vld [vmem:[%s1880_s20 + $0x58] sm:$0xff]  ;;  %v1980_v42 = vld [vmem:[%s1880_s20 + $0x90] sm:$0x7]  ;;  %v1983_v44 = vld [vmem:[%s1880_s20 + $0x60] sm:$0xff]  ;;  %v347_v48 = vmax.f32 %v1923_v26, %v1957_v35  ;;  %v339_v49 = vsel %vm2546_vm0, %v1968_v38, -inf  ;;  %v356_v51 = vmax.f32 %v1926_v27, %v1965_v37 }
  0x1d   : > { %v1986_v45 = vld [vmem:[%s1880_s20 + $0x98] sm:$0x7]  ;;  %v1989_v46 = vld [vmem:[%s1880_s20 + $0xa0] sm:$0x7]  ;;  %v348_v50 = vsel %vm2546_vm0, %v1971_v39, -inf  ;;  %v357_v52 = vsel %vm2546_vm0, %v1980_v42, -inf  ;;  %v1467_v53 = vadd.f32 %v1623_v25, %v1466_v43  ;;  %v340_v57 = vmax.f32 %v337_v47, %v339_v49 }
  0x1e   : > { %v2004_v54 = vld [vmem:[%s1880_s20 + $0x28] sm:$0xff]  ;;  %v349_v58 = vmax.f32 %v347_v48, %v348_v50  ;;  %v365_v59 = vmax.f32 %v1951_v33, %v1977_v41  ;;  %v358_v60 = vmax.f32 %v356_v51, %v357_v52  ;;  %v366_v61 = vsel %vm2546_vm0, %v1986_v45, -inf  ;;  %v2021_v3 = vld [vmem:[%s1880_s20 + $0x30] sm:$0xff] }
  0x1f   : > { %v2007_v55 = vld [vmem:[%s1880_s20 + $0x68] sm:$0xff]  ;;  %v374_v62 = vmax.f32 %v1974_v40, %v1983_v44  ;;  %v375_v63 = vsel %vm2546_vm0, %v1989_v46, -inf  ;;  %v1468_v0 = vadd.f32 %v1624_v29, %v1467_v53  ;;  %v2024_v4 = vld [vmem:[%s1880_s20 + $0x70] sm:$0xff]  ;;  %v341_v5 = vrot.slane %v340_v57, 4 }
  0x20   : > { %v2010_v56 = vld [vmem:[%s1880_s20 + $0xa8] sm:$0x7]  ;;  %v350_v6 = vrot.slane %v349_v58, 4  ;;  %v367_v7 = vmax.f32 %v365_v59, %v366_v61  ;;  %v359_v8 = vrot.slane %v358_v60, 4  ;;  %v383_v10 = vmax.f32 %v2004_v54, %v2007_v55  ;;  %v2031_v23 = vld [vmem:[%s1880_s20 + $0xb0] sm:$0x7] }
  0x21   : > { %v376_v9 = vmax.f32 %v374_v62, %v375_v63  ;;  %v384_v11 = vsel %vm2546_vm0, %v2010_v56, -inf  ;;  %v1469_v12 = vadd.f32 %v1625_v30, %v1468_v0  ;;  %v342_v24 = vmax.f32 %v340_v57, %v341_v5  ;;  %v2038_v0 = vld [vmem:[%s1880_s20 + $0x38] sm:$0xff] }
  0x22   : > { %v351_v25 = vmax.f32 %v349_v58, %v350_v6  ;;  %v368_v29 = vrot.slane %v367_v7, 4  ;;  %v360_v43 = vmax.f32 %v358_v60, %v359_v8  ;;  %v385_v48 = vmax.f32 %v383_v10, %v384_v11  ;;  %v2041_v5 = vld [vmem:[%s1880_s20 + $0x78] sm:$0xff] }
  0x23   : > { %v377_v47 = vrot.slane %v376_v9, 4  ;;  %v392_v49 = vmax.f32 %v2021_v3, %v2024_v4  ;;  %v1470_v50 = vadd.f32 %v1626_v31, %v1469_v12  ;;  %v343_v51 = vrot.slane %v342_v24, 2 }
  0x24   : > { %v352_v52 = vrot.slane %v351_v25, 2  ;;  %v369_v53 = vmax.f32 %v367_v7, %v368_v29  ;;  %v361_v59 = vrot.slane %v360_v43, 2  ;;  %v386_v30 = vrot.slane %v385_v48, 4  ;;  %v2045_v29 = vld [vmem:[%s1880_s20 + $0xb8] sm:$0x7] }
  0x25   : > { %v378_v61 = vmax.f32 %v376_v9, %v377_v47  ;;  %v393_v57 = vsel %vm2546_vm0, %v2031_v23, -inf  ;;  %v1471_v58 = vadd.f32 %v1627_v32, %v1470_v50  ;;  %v344_v60 = vmax.f32 %v342_v24, %v343_v51 }
  0x26   : > { %v353_v62 = vmax.f32 %v351_v25, %v352_v52  ;;  %v370_v63 = vrot.slane %v369_v53, 2  ;;  %v362_v6 = vmax.f32 %v360_v43, %v361_v59  ;;  %v387_v8 = vmax.f32 %v385_v48, %v386_v30 }
  0x27   : > { %v379_v31 = vrot.slane %v378_v61, 2  ;;  %v394_v10 = vmax.f32 %v392_v49, %v393_v57  ;;  %v1472_v7 = vadd.f32 %v1962_v36, %v1471_v58  ;;  %v345_v9 = vrot.slane %v344_v60, 1 }
  0x28   : > { %v354_v11 = vrot.slane %v353_v62, 1  ;;  %v371_v12 = vmax.f32 %v369_v53, %v370_v63  ;;  %v363_v47 = vrot.slane %v362_v6, 1  ;;  %v388_v24 = vrot.slane %v387_v8, 2 }
  0x29   : > { %v380_v32 = vmax.f32 %v378_v61, %v379_v31  ;;  %v395_v25 = vrot.slane %v394_v10, 4  ;;  %1473 = vadd.xlane.f32.xlu0 %v1472_v7  ;;  %v401_v51 = vmax.f32 %v2038_v0, %v2041_v5  ;;  %v2049_v43 = vmax.f32 %v344_v60, %v345_v9 }
  0x2a   : > { %v372_v50 = vrot.slane %v371_v12, 1  ;;  %v389_v49 = vmax.f32 %v387_v8, %v388_v24  ;;  %v2051_v36 = vmax.f32 %v353_v62, %v354_v11  ;;  %v2053_v59 = vmax.f32 %v362_v6, %v363_v47 }
  0x2b   : > { %v381_v48 = vrot.slane %v380_v32, 1  ;;  %v396_v52 = vmax.f32 %v394_v10, %v395_v25  ;;  %v402_v61 = vsel %vm2546_vm0, %v2045_v29, -inf  ;;  %v2062_v60 = vadd.s32 16, %v1852_v2 }
  0x2c   : > { %v2055_v53 = vmax.f32 %v371_v12, %v372_v50  ;;  %v390_v30 = vrot.slane %v389_v49, 1  ;;  %v403_v58 = vmax.f32 %v401_v51, %v402_v61  ;;  %v410_v6 = vsub.f32 %v1907_v22, %v2049_v43 }
  0x2d   : > { %v397_v57 = vrot.slane %v396_v52, 2  ;;  %v2059_v63 = vmax.f32 %v380_v32, %v381_v48  ;;  %2568 = vst [vmem:[#allocation8_spill] sm:$0xff] %v2062_v60  ;;  %v411_v10 = vsub.f32 %v1923_v26, %v2051_v36  ;;  %v412_v7 = vsub.f32 %v1926_v27, %v2053_v59 }
  0x2e   : > { %v2064_v31 = vmax.f32 %v389_v49, %v390_v30  ;;  %v404_v62 = vrot.slane %v403_v58, 4  ;;  %v413_v9 = vsub.f32 %v1951_v33, %v2055_v53  ;;  %v2075_v11 = vadd.s32 8, %v1852_v2 }
  0x2f   : > { %v398_v8 = vmax.f32 %v396_v52, %v397_v57  ;;  %v418_v32 = vsub.f32 %v1954_v34, %v2049_v43  ;;  %v419_v22 = vsub.f32 %v1957_v35, %v2051_v36  ;;  %v414_v26 = vsub.f32 %v1974_v40, %v2059_v63 }
  0x30   : > { %2569 = vst [vmem:[#allocation9_spill] sm:$0xff] %v2075_v11  ;;  %v405_v47 = vmax.f32 %v403_v58, %v404_v62  ;;  %v420_v27 = vsub.f32 %v1965_v37, %v2053_v59  ;;  %v421_v33 = vsub.f32 %v1977_v41, %v2055_v53  ;;  %v422_v24 = vsub.f32 %v1983_v44, %v2059_v63 }
  0x31   : > { %v399_v12 = vrot.slane %v398_v8, 1  ;;  %v415_v34 = vsub.f32 %v2004_v54, %v2064_v31  ;;  %v434_v51 = vmul.f32 1.442695, %v410_v6  ;;  %v423_v35 = vsub.f32 %v2007_v55, %v2064_v31 }
  0x32   : > { %v406_v50 = vrot.slane %v405_v47, 2  ;;  %v426_v40 = vsub.f32 %v1968_v38, %v2049_v43  ;;  %v436_v48 = vmul.f32 1.442695, %v411_v10  ;;  %v438_v37 = vmul.f32 1.442695, %v412_v7 }
  0x33   : > { %v400_v25 = vmax.f32 %v398_v8, %v399_v12  ;;  %v427_v44 = vsub.f32 %v1971_v39, %v2051_v36  ;;  %v440_v52 = vmul.f32 1.442695, %v413_v9  ;;  %v428_v61 = vsub.f32 %v1980_v42, %v2053_v59 }
  0x34   : > { %v407_v49 = vmax.f32 %v405_v47, %v406_v50  ;;  %v429_v54 = vsub.f32 %v1986_v45, %v2055_v53  ;;  %1698 = vpow2.f32 %v434_v51  ;;  %v442_v55 = vmul.f32 1.442695, %v414_v26 }
  0x35   : > { %v416_v41 = vsub.f32 %v2021_v3, %v400_v25  ;;  %v430_v38 = vsub.f32 %v1989_v46, %v2059_v63  ;;  %1700 = vpow2.f32 %v436_v48  ;;  %v444_v43 = vmul.f32 1.442695, %v415_v34 }
  0x36   : > { %v408_v30 = vrot.slane %v407_v49, 1  ;;  %v424_v3 = vsub.f32 %v2024_v4, %v400_v25  ;;  %v431_v39 = vsub.f32 %v2010_v56, %v2064_v31  ;;  %1702 = vpow2.f32 %v438_v37 }
  0x37   : > { %v446_v36 = vmul.f32 1.442695, %v416_v41  ;;  %v432_v42 = vsub.f32 %v2031_v23, %v400_v25  ;;  %1704 = vpow2.f32 %v440_v52  ;;  %v450_v45 = vmul.f32 1.442695, %v418_v32  ;;  %v916_v41 = vld [vmem:[#allocation4 + $0xb0] sm:$0x7] }
  0x38   : > { %v409_v57 = vmax.f32 %v407_v49, %v408_v30  ;;  %1706 = vpow2.f32 %v442_v55  ;;  %v452_v59 = vmul.f32 1.442695, %v419_v22  ;;  %v454_v53 = vmul.f32 1.442695, %v420_v27  ;;  %v917_v52 = vld [vmem:[#allocation4 + $0x10] sm:$0x7] }
  0x39   : > { %v456_v58 = vmul.f32 1.442695, %v421_v33  ;;  %1708 = vpow2.f32 %v444_v43  ;;  %v458_v4 = vmul.f32 1.442695, %v422_v24  ;;  %v460_v56 = vmul.f32 1.442695, %v423_v35 }
  0x3a   : > { %v417_v46 = vsub.f32 %v2038_v0, %v409_v57  ;;  %v425_v63 = vsub.f32 %v2041_v5, %v409_v57  ;;  %v433_v8 = vsub.f32 %v2045_v29, %v409_v57  ;;  %1710 = vpow2.f32 %v446_v36  ;;  %v920_v43 = vld [vmem:[#allocation4 + $0x50] sm:$0x7] }
  0x3b   : > { %v462_v31 = vmul.f32 1.442695, %v424_v3  ;;  %1712 = vpow2.f32 %v450_v45  ;;  %v466_v23 = vmul.f32 1.442695, %v426_v40  ;;  %v468_v6 = vmul.f32 1.442695, %v427_v44 }
  0x3c   : > { %v448_v62 = vmul.f32 1.442695, %v417_v46  ;;  %1714 = vpow2.f32 %v452_v59  ;;  %v470_v10 = vmul.f32 1.442695, %v428_v61  ;;  %v472_v7 = vmul.f32 1.442695, %v429_v54 }
  0x3d   : > { %v474_v9 = vmul.f32 1.442695, %v430_v38  ;;  %v464_v12 = vmul.f32 1.442695, %v425_v63  ;;  %v476_v0 = vmul.f32 1.442695, %v431_v39  ;;  %vm638_vm11 = vcmp.eq.s32.totalorder %v2062_v60, %v1869_v14 }
  0x3e   : > { %1716 = vpow2.f32 %v448_v62  ;;  %v2111_v47 = vmul.f32 1.442695, %v432_v42  ;;  %v2113_v5 = vmul.f32 1.442695, %v433_v8  ;;  %vm645_vm12 = vcmp.eq.s32.totalorder %v2062_v60, %v1888_v21  ;;  %v918_v61 = vld [vmem:[#allocation4 + $0x68] sm:$0x7] }
  0x3f   : > { %1718 = vpow2.f32 %v454_v53  ;;  %vm630_vm13 = vcmp.eq.s32.totalorder %v2075_v11, %v1869_v14  ;;  %vm639_vm14 = vcmp.eq.s32.totalorder %v2062_v60, %v1871_v15  ;;  %vm640_vm15 = vcmp.eq.s32.totalorder %v2062_v60, %v1873_v16  ;;  %v919_v38 = vld [vmem:[#allocation4 + $0x30] sm:$0x7]  ;;  %v921_v42 = vld [vmem:[#allocation4 + $0x60] sm:$0x7] }
  0x40   : > { %1720 = vpow2.f32 %v456_v58  ;;  %vm631_vm8 = vcmp.eq.s32.totalorder %v2075_v11, %v1871_v15  ;;  %vm632_vm7 = vcmp.eq.s32.totalorder %v2075_v11, %v1873_v16  ;;  %vm2550_vm6 = vcmp.eq.s32.totalorder %v2075_v11, %v1875_v17  ;;  %v922_v46 = vld [vmem:[#allocation4 + $0x20] sm:$0x7] }
  0x41   : > { %1722 = vpow2.f32 %v458_v4  ;;  %vm641_vm5 = vcmp.eq.s32.totalorder %v2062_v60, %v1875_v17  ;;  %vm2549_vm3 = vcmp.eq.s32.totalorder %v2075_v11, %v1882_v18  ;;  %vm2548_vm2 = vcmp.eq.s32.totalorder %v2075_v11, %v1884_v19  ;;  %v2141_v29 = vpop.eup %1698  ;;  %v923_v63 = vld [vmem:[#allocation4 + $0x80] sm:$0x7] }
  0x42   : > { %vm2547_vm1 = vcmp.eq.s32.totalorder %v2075_v11, %v1886_v20  ;;  %1724 = vpow2.f32 %v460_v56  ;;  %vm637_vm0 = vcmp.eq.s32.totalorder %v2075_v11, %v1888_v21  ;;  %v1629_v32 = vsel %vm630_vm13, 1.0, %v1786_v1  ;;  %v2153_v26 = vpop.eup %1700 }
  0x43   : > { %v1630_v22 = vsel %vm631_vm8, 1.0, %v1786_v1  ;;  %1726 = vpow2.f32 %v462_v31  ;;  %vm2157_vm4 = vmand %vm637_vm0, %vm667_vm9  ;;  %v2570_v27 = vmov 0  ;;  %v1631_v33 = vsel %vm632_vm7, 1.0, %v1786_v1  ;;  %v2173_v50 = vpop.eup %1702 }
  0x44   : > { %v2571_v27 = vsel %vm2157_vm4, 4294967295, %v2570_v27  ;;  %v1632_v24 = vsel %vm2550_vm6, 1.0, %v1786_v1  ;;  %v1633_v25 = vsel %vm2549_vm3, 1.0, %v1786_v1  ;;  %1728 = vpow2.f32 %v464_v12  ;;  %v2190_v40 = vpop.eup %1704 }
  0x45   : > { %2572 = vst [vmem:[#allocation10_spill] sm:$0xff] %v2571_v27  ;;  %v1634_v34 = vsel %vm2548_vm2, 1.0, %v1786_v1  ;;  %v2183_v51 = vsel %vm2547_vm1, 1.0, %v1786_v1  ;;  %v2188_v35 = vsel %vm2157_vm4, 1.0, %v1786_v1  ;;  %1730 = vpow2.f32 %v466_v23  ;;  %v2192_v48 = vpop.eup %1706  ;;  %vm2223_vm2 = vmand %vm645_vm12, %vm667_vm9 }
  0x46   : > { %1732 = vpow2.f32 %v468_v6  ;;  %v2194_v37 = vpop.eup %1708  ;;  %v1475_v49 = vadd.f32 %v1630_v22, %v1629_v32  ;;  %vm643_vm0 = vcmp.eq.s32.totalorder %v2062_v60, %v1884_v19  ;;  %vm644_vm1 = vcmp.eq.s32.totalorder %v2062_v60, %v1886_v20 }
  0x47   : > { %1734 = vpow2.f32 %v470_v10  ;;  %v2196_v44 = vpop.eup %1710  ;;  %v1637_v54 = vsel %vm638_vm11, 1.0, %v1786_v1  ;;  %v1638_v3 = vsel %vm639_vm14, 1.0, %v1786_v1  ;;  %v1639_v39 = vsel %vm640_vm15, 1.0, %v1786_v1 }
  0x48   : > { %1736 = vpow2.f32 %v472_v7  ;;  %v2206_v55 = vpop.eup %1712  ;;  %v1476_v30 = vadd.f32 %v1631_v33, %v1475_v49  ;;  %v2573_v57 = vmov 0  ;;  %v1640_v45 = vsel %vm641_vm5, 1.0, %v1786_v1 }
  0x49   : > { %1738 = vpow2.f32 %v474_v9  ;;  %v2216_v36 = vpop.eup %1714  ;;  %v2574_v57 = vsel %vm2223_vm2, 4294967295, %v2573_v57  ;;  %vm2576_vm3 = vcmp.eq.s32.totalorder %v2062_v60, %v1882_v18  ;;  %v1642_v21 = vsel %vm643_vm0, 1.0, %v1786_v1 }
  0x4a   : > { %1740 = vpow2.f32 %v476_v0  ;;  %2575 = vst [vmem:[#allocation11_spill] sm:$0xff] %v2574_v57  ;;  %v1641_v59 = vsel %vm2576_vm3, 1.0, %v1786_v1  ;;  %v1477_v58 = vadd.f32 %v1632_v24, %v1476_v30  ;;  %v1643_v4 = vsel %vm644_vm1, 1.0, %v1786_v1 }
  0x4b   : > { %v2239_v53 = vpop.eup %1716  ;;  %1742 = vpow2.f32 %v2111_v47  ;;  %v1644_v8 = vsel %vm2223_vm2, 1.0, %v1786_v1  ;;  %v988_v31 = vadd.f32 %v1637_v54, %v916_v41  ;;  %v989_v62 = vadd.f32 %v1638_v3, %v917_v52 }
  0x4c   : > { %v2249_v56 = vpop.eup %1718  ;;  %1744 = vpow2.f32 %v2113_v5  ;;  %v990_v23 = vadd.f32 %v1639_v39, %v918_v61  ;;  %v1478_v10 = vadd.f32 %v1633_v25, %v1477_v58  ;;  %v991_v7 = vadd.f32 %v1640_v45, %v919_v38 }
  0x4d   : > { %v2252_v6 = vpop.eup %1720  ;;  %v992_v9 = vadd.f32 %v1641_v59, %v920_v43  ;;  %v993_v0 = vadd.f32 %v1642_v21, %v921_v42  ;;  %v994_v47 = vadd.f32 %v1643_v4, %v922_v46  ;;  %v995_v32 = vadd.f32 %v1644_v8, %v923_v63  ;;  %1012 = vst [vmem:[#allocation4 + $0xb0] sm:$0x7] %v988_v31 }
  0x4e   : > { %v2254_v12 = vpop.eup %1722  ;;  %1013 = vst [vmem:[#allocation4 + $0x10] sm:$0x7] %v989_v62  ;;  %1014 = vst [vmem:[#allocation4 + $0x68] sm:$0x7] %v990_v23  ;;  %v1479_v22 = vadd.f32 %v1634_v34, %v1478_v10  ;;  %v482_v33 = vadd.f32 %v2206_v55, %v2141_v29  ;;  %v491_v25 = vadd.f32 %v2216_v36, %v2153_v26  ;;  %vm2577_vm3 = vcmask 1042432  }
  0x4f   : > { %v2256_v1 = vpop.eup %1724  ;;  %1015 = vst [vmem:[#allocation4 + $0x30] sm:$0x7] %v991_v7  ;;  %1016 = vst [vmem:[#allocation4 + $0x50] sm:$0x7] %v992_v9  ;;  %v500_v34 = vadd.f32 %v2249_v56, %v2173_v50  ;;  %v509_v54 = vadd.f32 %v2252_v6, %v2190_v40  ;;  %v518_v3 = vadd.f32 %v2254_v12, %v2192_v48 }
  0x50   : > { %v2258_v5 = vpop.eup %1726  ;;  %1017 = vst [vmem:[#allocation4 + $0x60] sm:$0x7] %v993_v0  ;;  %1018 = vst [vmem:[#allocation4 + $0x20] sm:$0x7] %v994_v47  ;;  %v1480_v49 = vadd.f32 %v2183_v51, %v1479_v22  ;;  %v527_v59 = vadd.f32 %v2256_v1, %v2194_v37 }
  0x51   : > { %1019 = vst [vmem:[#allocation4 + $0x80] sm:$0x7] %v995_v32  ;;  %v2262_v24 = vpop.eup %1728  ;;  %vm2579_vm12 = vmmov %vm2577_vm3  ;;  %v536_v63 = vadd.f32 %v2258_v5, %v2196_v44 }
  0x52   : > { %v2267_v41 = vpop.eup %1730  ;;  %v2278_v30 = vadd.f32 %v2188_v35, %v1480_v49  ;;  %vm2580_vm6 = vmmov %vm2577_vm3  ;;  %v545_v23 = vadd.f32 %v2262_v24, %v2239_v53 }
  0x53   : > { %v2271_v52 = vpop.eup %1732  ;;  %v483_v61 = vsel %vm2577_vm3, %v2267_v41, 0.0 }
  0x54   : > { %2578 = vst [vmem:[#allocation12_spill] sm:$0xff] %v2278_v30  ;;  %v2280_v38 = vpop.eup %1734  ;;  %v484_v43 = vadd.f32 %v483_v61, %v482_v33  ;;  %v492_v51 = vsel %vm2579_vm12, %v2271_v52, 0.0  ;;  %vm2581_vm12 = vmmov %vm2577_vm3 }
  0x55   : > { %v2286_v39 = vpop.eup %1736  ;;  %v493_v42 = vadd.f32 %v492_v51, %v491_v25  ;;  %v501_v45 = vsel %vm2577_vm3, %v2280_v38, 0.0 }
  0x56   : > { %v2292_v35 = vpop.eup %1738  ;;  %v485_v21 = vrot.slane %v484_v43, 4  ;;  %v502_v58 = vadd.f32 %v501_v45, %v500_v34  ;;  %v510_v46 = vsel %vm2580_vm6, %v2286_v39, 0.0  ;;  %vm2582_vm6 = vmmov %vm2577_vm3 }
  0x57   : > { %v2298_v4 = vpop.eup %1740  ;;  %v494_v8 = vrot.slane %v493_v42, 4  ;;  %v511_v31 = vadd.f32 %v510_v46, %v509_v54  ;;  %v519_v62 = vsel %vm2581_vm12, %v2292_v35, 0.0  ;;  %vm2583_vm12 = vmmov %vm2577_vm3 }
  0x58   : > { %v2304_v10 = vpop.eup %1742  ;;  %v486_v7 = vadd.f32 %v485_v21, %v484_v43  ;;  %v503_v9 = vrot.slane %v502_v58, 4  ;;  %v520_v0 = vadd.f32 %v519_v62, %v518_v3  ;;  %v528_v47 = vsel %vm2582_vm6, %v2298_v4, 0.0  ;;  %vm2584_vm6 = vmmov %vm2577_vm3 }
  0x59   : > { %v2308_v32 = vpop.eup %1744  ;;  %v495_v22 = vadd.f32 %v494_v8, %v493_v42  ;;  %v512_v33 = vrot.slane %v511_v31, 4  ;;  %v529_v25 = vadd.f32 %v528_v47, %v527_v59  ;;  %v537_v49 = vsel %vm2577_vm3, %v2304_v10, 0.0 }
  0x5a   : > { %v487_v34 = vrot.slane %v486_v7, 2  ;;  %v504_v61 = vadd.f32 %v503_v9, %v502_v58  ;;  %v521_v54 = vrot.slane %v520_v0, 4  ;;  %v538_v51 = vadd.f32 %v537_v49, %v536_v63 }
  0x5b   : > { %v496_v45 = vrot.slane %v495_v22, 2  ;;  %v513_v46 = vadd.f32 %v512_v33, %v511_v31  ;;  %v530_v43 = vrot.slane %v529_v25, 4  ;;  %v546_v3 = vsel %vm2583_vm12, %v2308_v32, 0.0  ;;  %vm2585_vm12 = vmmov %vm2577_vm3 }
  0x5c   : > { %v488_v21 = vadd.f32 %v487_v34, %v486_v7  ;;  %v505_v62 = vrot.slane %v504_v61, 2  ;;  %v522_v30 = vadd.f32 %v521_v54, %v520_v0  ;;  %v539_v27 = vrot.slane %v538_v51, 4 }
  0x5d   : > { %v497_v42 = vadd.f32 %v496_v45, %v495_v22  ;;  %v514_v8 = vrot.slane %v513_v46, 2  ;;  %v531_v59 = vadd.f32 %v530_v43, %v529_v25  ;;  %v547_v47 = vadd.f32 %v546_v3, %v545_v23 }
  0x5e   : > { %v489_v11 = vrot.slane %v488_v21, 1  ;;  %v506_v57 = vadd.f32 %v505_v62, %v504_v61  ;;  %v523_v60 = vrot.slane %v522_v30, 2  ;;  %v540_v58 = vadd.f32 %v539_v27, %v538_v51 }
  0x5f   : > { %v498_v9 = vrot.slane %v497_v42, 1  ;;  %v515_v63 = vadd.f32 %v514_v8, %v513_v46  ;;  %v532_v49 = vrot.slane %v531_v59, 2  ;;  %v548_v31 = vrot.slane %v547_v47, 4 }
  0x60   : > { %v490_v33 = vadd.f32 %v489_v11, %v488_v21  ;;  %v507_v20 = vrot.slane %v506_v57, 1  ;;  %v524_v19 = vadd.f32 %v523_v60, %v522_v30  ;;  %v541_v18 = vrot.slane %v540_v58, 2 }
  0x61   : > { %v499_v7 = vadd.f32 %v498_v9, %v497_v42  ;;  %v516_v34 = vrot.slane %v515_v63, 1  ;;  %v533_v0 = vadd.f32 %v532_v49, %v531_v59  ;;  %v549_v54 = vadd.f32 %v548_v31, %v547_v47 }
  0x62   : > { %v508_v22 = vadd.f32 %v507_v20, %v506_v57  ;;  %v525_v45 = vrot.slane %v524_v19, 1  ;;  %v542_v25 = vadd.f32 %v541_v18, %v540_v58  ;;  %1746 = vrcp.f32 %v490_v33  ;;  %v1458_v20 = vld [vmem:[#allocation4 + $0xb0] sm:$0x7]  ;;  %v1460_v18 = vld [vmem:[#allocation4 + $0x68] sm:$0x7] }
  0x63   : > { %v517_v23 = vadd.f32 %v516_v34, %v515_v63  ;;  %v534_v61 = vrot.slane %v533_v0, 1  ;;  %v550_v43 = vrot.slane %v549_v54, 2  ;;  %1748 = vrcp.f32 %v499_v7  ;;  %v1459_v57 = vld [vmem:[#allocation4 + $0x10] sm:$0x7] }
  0x64   : > { %v526_v27 = vadd.f32 %v525_v45, %v524_v19  ;;  %v543_v51 = vrot.slane %v542_v25, 1  ;;  %1750 = vrcp.f32 %v508_v22  ;;  %v1484_v21 = vsel %vm2584_vm6, %v1458_v20, 0.0  ;;  %v851_v20 = vld [vmem:[#allocation3 + $0x90] sm:$0x7] }
  0x65   : > { %v535_v46 = vadd.f32 %v534_v61, %v533_v0  ;;  %v551_v11 = vadd.f32 %v550_v43, %v549_v54  ;;  %1752 = vrcp.f32 %v517_v23  ;;  %v1485_v62 = vsel %vm2577_vm3, %v1459_v57, 0.0  ;;  %v844_v61 = vld [vmem:[#allocation3 + $0x58] sm:$0x7] }
  0x66   : > { %v544_v60 = vadd.f32 %v543_v51, %v542_v25  ;;  %1754 = vrcp.f32 %v526_v27  ;;  %v2322_v47 = vadd.f32 %v1485_v62, %v1484_v21  ;;  %v2325_v58 = vsel %vm2585_vm12, %v1460_v18, 0.0 }
  0x67   : > { %v552_v30 = vrot.slane %v551_v11, 1  ;;  %1756 = vrcp.f32 %v535_v46  ;;  %v846_v46 = vld [vmem:[#allocation3] sm:$0x7]  ;;  %vm2587_vm6 = vcmp.eq.s32.totalorder %v1852_v2, %v1871_v15  ;;  %vm2588_vm3 = vcmp.eq.s32.totalorder %v1852_v2, %v1873_v16 }
  0x68   : > { %1758 = vrcp.f32 %v544_v60  ;;  %v849_v60 = vld [vmem:[#allocation3 + $0x80] sm:$0x7]  ;;  %vm2589_vm12 = vcmp.eq.s32.totalorder %v1852_v2, %v1875_v17 }
  0x69   : > { %v553_v3 = vadd.f32 %v552_v30, %v551_v11 }
  0x6b   : > { %1760 = vrcp.f32 %v553_v3  ;;  %v850_v3 = vld [vmem:[#allocation3 + $0x8] sm:$0x7] }
  0x6f   : > { %v1747_v19 = vpop.eup %1746 }
  0x70   : > { %v1749_v42 = vpop.eup %1748  ;;  %v2317_v8 = vmul.f32 %v1747_v19, %v2206_v55  ;;  %v2320_v59 = vmul.f32 %v1747_v19, %v2141_v29  ;;  %v2334_v31 = vmul.f32 %v1747_v19, %v2267_v41 }
  0x71   : > { %v1751_v9 = vpop.eup %1750  ;;  %v2328_v63 = vmul.f32 %v1749_v42, %v2216_v36  ;;  %v2331_v49 = vmul.f32 %v1749_v42, %v2153_v26  ;;  %v2337_v55 = vmul.f32 %v1749_v42, %v2271_v52 }
  0x72   : > { %v1753_v29 = vpop.eup %1752  ;;  %v2340_v33 = vmul.f32 %v1751_v9, %v2249_v56  ;;  %v564_v7 = vmul.f32 %v1751_v9, %v2173_v50  ;;  %v2365_v25 = vmul.f32 %v1751_v9, %v2280_v38  ;;  %v845_v38 = vld [vmem:[#allocation3 + $0x38] sm:$0x7]  ;;  %v868_v21 = vadd.f32 %v844_v61, %v2334_v31 }
  0x73   : > { %v1755_v34 = vpop.eup %1754  ;;  %v2344_v0 = vmul.f32 %v1753_v29, %v2252_v6  ;;  %v565_v36 = vmul.f32 %v1753_v29, %v2190_v40  ;;  %v1411_v56 = vadd.f32 %v2328_v63, %v2317_v8  ;;  %v869_v62 = vadd.f32 %v845_v38, %v2337_v55  ;;  %v748_v38 = vld [vmem:[#allocation2 + $0xa8] sm:$0x7] }
  0x74   : > { %v1757_v26 = vpop.eup %1756  ;;  %v2348_v54 = vmul.f32 %v1755_v34, %v2254_v12  ;;  %v566_v41 = vmul.f32 %v1755_v34, %v2192_v48  ;;  %v1402_v48 = vadd.f32 %v2331_v49, %v2320_v59  ;;  %v870_v19 = vadd.f32 %v846_v46, %v2365_v25  ;;  %892 = vst [vmem:[#allocation3 + $0x58] sm:$0x7] %v868_v21  ;;  %v749_v46 = vld [vmem:[#allocation2 + $0x68] sm:$0x7] }
  0x75   : > { %v1759_v52 = vpop.eup %1758  ;;  %v2352_v22 = vmul.f32 %v1757_v26, %v2256_v1  ;;  %v567_v50 = vmul.f32 %v1757_v26, %v2194_v37  ;;  %v1412_v45 = vadd.f32 %v1411_v56, %v2340_v33  ;;  %v2375_v27 = vmul.f32 %v1757_v26, %v2298_v4  ;;  %v848_v4 = vld [vmem:[#allocation3 + $0x48] sm:$0x7]  ;;  %893 = vst [vmem:[#allocation3 + $0x38] sm:$0x7] %v869_v62 }
  0x76   : > { %v2358_v6 = vmul.f32 %v1759_v52, %v2258_v5  ;;  %v568_v40 = vmul.f32 %v1759_v52, %v2196_v44  ;;  %v581_v5 = vmul.f32 %v1753_v29, %v2286_v39  ;;  %v1403_v43 = vadd.f32 %v1402_v48, %v564_v7  ;;  %894 = vst [vmem:[#allocation3] sm:$0x7] %v870_v19 }
  0x77   : > { %v1413_v23 = vadd.f32 %v1412_v45, %v2344_v0  ;;  %v2372_v44 = vmul.f32 %v1755_v34, %v2292_v35  ;;  %v2378_v51 = vmul.f32 %v1759_v52, %v2304_v10  ;;  %v873_v34 = vadd.f32 %v849_v60, %v2375_v27  ;;  %v2596_v60 = vld [vmem:[#allocation8_spill] sm:$0xff] }
  0x78   : > { %v1761_v12 = vpop.eup %1760  ;;  %v1404_v30 = vadd.f32 %v1403_v43, %v565_v36  ;;  %v757_v45 = vsel %vm2587_vm6, %v2331_v49, 0.0 }
  0x79   : > { %v577_v1 = vmul.f32 %v1761_v12, %v2262_v24  ;;  %v569_v37 = vmul.f32 %v1761_v12, %v2239_v53  ;;  %v847_v24 = vld [vmem:[#allocation3 + $0x88] sm:$0x7]  ;;  %v1414_v53 = vadd.f32 %v1413_v23, %v2348_v54  ;;  %v585_v35 = vmul.f32 %v1761_v12, %v2308_v32  ;;  %897 = vst [vmem:[#allocation3 + $0x80] sm:$0x7] %v873_v34 }
  0x7a   : > { %v1405_v32 = vadd.f32 %v1404_v30, %v566_v41  ;;  %v871_v42 = vadd.f32 %v847_v24, %v581_v5  ;;  %v872_v9 = vadd.f32 %v848_v4, %v2372_v44  ;;  %v874_v26 = vadd.f32 %v850_v3, %v2378_v51  ;;  %v750_v24 = vld [vmem:[#allocation2 + $0x30] sm:$0x7]  ;;  %v752_v4 = vld [vmem:[#allocation2 + $0x80] sm:$0x7] }
  0x7b   : > { %v2382_v11 = vsel %vm667_vm9, %v577_v1, 0.0  ;;  %v2387_v39 = vsel %vm667_vm9, %v569_v37, 0.0  ;;  %v1415_v57 = vadd.f32 %v1414_v53, %v2352_v22  ;;  %v2396_v18 = vsel %vm667_vm9, %v585_v35, 0.0  ;;  %v2592_v37 = vld [vmem:[#allocation6_spill] sm:$0xff]  ;;  %v751_v35 = vld [vmem:[#allocation2 + $0x58] sm:$0x7] }
  0x7c   : > { %v763_v10 = vsel %vm1930_vm10, %v2387_v39, 0.0  ;;  %v875_v13 = vadd.f32 %v851_v20, %v2396_v18  ;;  %v1406_v52 = vadd.f32 %v1405_v32, %v567_v50  ;;  %895 = vst [vmem:[#allocation3 + $0x88] sm:$0x7] %v871_v42  ;;  %896 = vst [vmem:[#allocation3 + $0x48] sm:$0x7] %v872_v9  ;;  %vm2586_vm9 = vcmp.eq.s32.totalorder %v1852_v2, %v1869_v14 }
  0x7d   : > { %v1416_v29 = vadd.f32 %v1415_v57, %v2358_v6  ;;  %v756_v56 = vsel %vm2586_vm9, %v2320_v59, 0.0  ;;  %v758_v12 = vsel %vm2588_vm3, %v564_v7, 0.0  ;;  %898 = vst [vmem:[#allocation3 + $0x8] sm:$0x7] %v874_v26  ;;  %v759_v1 = vsel %vm2589_vm12, %v565_v36, 0.0  ;;  %v2590_v59 = vld [vmem:[#allocation5_spill] sm:$0xff] }
  0x7e   : > { %899 = vst [vmem:[#allocation3 + $0x90] sm:$0x7] %v875_v13  ;;  %vm2591_vm9 = vcmp.eq.s32.totalorder %v1852_v2, %v2590_v59  ;;  %vm2593_vm6 = vcmp.eq.s32.totalorder %v1852_v2, %v2592_v37  ;;  %v1407_v61 = vadd.f32 %v1406_v52, %v568_v40  ;;  %v2594_v7 = vld [vmem:[#allocation7_spill] sm:$0xff]  ;;  %v1338_v53 = vadd.f32 %v757_v45, %v756_v56  ;;  %v1394_v20 = vld [vmem:[#allocation3 + $0x58] sm:$0x7] }
  0x7f   : > { %v1417_v48 = vadd.f32 %v1416_v29, %v2382_v11  ;;  %v760_v23 = vsel %vm2591_vm9, %v566_v41, 0.0  ;;  %v761_v49 = vsel %vm2593_vm6, %v567_v50, 0.0  ;;  %vm2595_vm3 = vcmp.eq.s32.totalorder %v1852_v2, %v2594_v7  ;;  %v753_v41 = vld [vmem:[#allocation2 + $0xb8] sm:$0x7]  ;;  %v1461_v3 = vld [vmem:[#allocation4 + $0x30] sm:$0x7] }
  0x80   : > { %v2430_v43 = vsel %vm2595_vm3, %v568_v40, 0.0  ;;  %v1408_v36 = vadd.f32 %v1407_v61, %v2387_v39  ;;  %v772_v50 = vsel %vm638_vm11, %v2334_v31, 0.0  ;;  %v773_v2 = vsel %vm639_vm14, %v2337_v55, 0.0  ;;  %v1395_v57 = vld [vmem:[#allocation3 + $0x38] sm:$0x7] }
  0x81   : > { %1418 = vadd.xlane.f32.xlu0 %v1417_v48  ;;  %v774_v40 = vsel %vm640_vm15, %v2365_v25, 0.0  ;;  %v775_v30 = vsel %vm641_vm5, %v581_v5, 0.0  ;;  %v1339_v21 = vadd.f32 %v1338_v53, %v758_v12  ;;  %vm2597_vm11 = vcmp.eq.s32.totalorder %v2596_v60, %v2590_v59  ;;  %v1396_v62 = vld [vmem:[#allocation3] sm:$0x7]  ;;  %v755_v48 = vld [vmem:[#allocation2 + $0x8] sm:$0x7] }
  0x82   : > { %1409 = vadd.xlane.f32.xlu1 %v1408_v36  ;;  %v776_v31 = vsel %vm2597_vm11, %v2372_v44, 0.0  ;;  %v777_v55 = vsel %vm643_vm0, %v2375_v27, 0.0  ;;  %v796_v25 = vadd.f32 %v772_v50, %v748_v38  ;;  %v754_v5 = vld [vmem:[#allocation2 + $0x20] sm:$0x7]  ;;  %v797_v42 = vadd.f32 %v773_v2, %v749_v46 }
  0x83   : > { %v1397_v32 = vld [vmem:[#allocation3 + $0x88] sm:$0x7]  ;;  %v798_v9 = vadd.f32 %v774_v40, %v750_v24  ;;  %v799_v29 = vadd.f32 %v775_v30, %v751_v35  ;;  %v800_v34 = vadd.f32 %v776_v31, %v752_v4  ;;  %v1399_v26 = vld [vmem:[#allocation3 + $0x80] sm:$0x7]  ;;  %v1340_v52 = vadd.f32 %v1339_v21, %v759_v1 }
  0x84   : > { %v1398_v19 = vld [vmem:[#allocation3 + $0x48] sm:$0x7]  ;;  %v801_v56 = vadd.f32 %v777_v55, %v753_v41  ;;  %820 = vst [vmem:[#allocation2 + $0xa8] sm:$0x7] %v796_v25  ;;  %vm2598_vm5 = vcmask 1042432   ;;  %v1488_v61 = vadd.f32 %v2325_v58, %v2322_v47  ;;  %v778_v35 = vsel %vm644_vm1, %v2378_v51, 0.0 }
  0x85   : > { %v1400_v13 = vld [vmem:[#allocation3 + $0x8] sm:$0x7]  ;;  %v1489_v44 = vsel %vm2598_vm5, %v1461_v3, 0.0  ;;  %vm2599_vm14 = vmmov %vm2598_vm5  ;;  %821 = vst [vmem:[#allocation2 + $0x68] sm:$0x7] %v797_v42  ;;  %v1341_v53 = vadd.f32 %v1340_v52, %v760_v23  ;;  %v779_v47 = vsel %vm2223_vm2, %v2396_v18, 0.0  ;;  %v802_v41 = vadd.f32 %v778_v35, %v754_v5 }
  0x86   : > { %v1420_v45 = vsel %vm2599_vm14, %v1394_v20, 0.0  ;;  %vm2600_vm15 = vmmov %vm2598_vm5  ;;  %822 = vst [vmem:[#allocation2 + $0x30] sm:$0x7] %v798_v9  ;;  %v803_v50 = vadd.f32 %v779_v47, %v755_v48  ;;  %v2607_v2 = vld [vmem:[#allocation9_spill] sm:$0xff]  ;;  %v764_v40 = vsel %vm630_vm13, %v2317_v8, 0.0  ;;  %v765_v23 = vsel %vm631_vm8, %v2328_v63, 0.0 }
  0x87   : > { %v1421_v27 = vsel %vm2600_vm15, %v1395_v57, 0.0  ;;  %vm2601_vm0 = vmmov %vm2598_vm5  ;;  %823 = vst [vmem:[#allocation2 + $0x58] sm:$0x7] %v799_v29  ;;  %v1342_v30 = vadd.f32 %v1341_v53, %v761_v49  ;;  %v766_v51 = vsel %vm632_vm7, %v2340_v33, 0.0  ;;  %vm2608_vm1 = vcmp.eq.s32.totalorder %v2607_v2, %v1875_v17  ;;  %v1401_v17 = vld [vmem:[#allocation3 + $0x90] sm:$0x7] }
  0x88   : > { %v1423_v12 = vsel %vm2601_vm0, %v1396_v62, 0.0  ;;  %824 = vst [vmem:[#allocation2 + $0x80] sm:$0x7] %v800_v34  ;;  %v1422_v38 = vadd.f32 %v1421_v27, %v1420_v45  ;;  %vm2602_vm12 = vmmov %vm2601_vm0  ;;  %v767_v18 = vsel %vm2608_vm1, %v2344_v0, 0.0  ;;  %vm2609_vm2 = vcmp.eq.s32.totalorder %v2607_v2, %v2590_v59  ;;  %v1464_v27 = vld [vmem:[#allocation4 + $0x20] sm:$0x7] }
  0x89   : > { %v1425_v1 = vsel %vm2602_vm12, %v1397_v32, 0.0  ;;  %vm2603_vm9 = vmmov %vm2601_vm0  ;;  %825 = vst [vmem:[#allocation2 + $0xb8] sm:$0x7] %v801_v56  ;;  %v768_v14 = vsel %vm2609_vm2, %v2348_v54, 0.0  ;;  %vm2610_vm13 = vcmp.eq.s32.totalorder %v2607_v2, %v2592_v37  ;;  %vm2611_vm7 = vcmp.eq.s32.totalorder %v2607_v2, %v2594_v7  ;;  %v1462_v7 = vld [vmem:[#allocation4 + $0x50] sm:$0x7] }
  0x8a   : > { %v1427_v46 = vsel %vm2603_vm9, %v1398_v19, 0.0  ;;  %vm2604_vm6 = vmmov %vm2601_vm0  ;;  %v1424_v58 = vadd.f32 %v1423_v12, %v1422_v38  ;;  %826 = vst [vmem:[#allocation2 + $0x20] sm:$0x7] %v802_v41  ;;  %v769_v15 = vsel %vm2610_vm13, %v2352_v22, 0.0  ;;  %v770_v16 = vsel %vm2611_vm7, %v2358_v6, 0.0 }
  0x8b   : > { %v1429_v24 = vsel %vm2604_vm6, %v1399_v26, 0.0  ;;  %vm2605_vm3 = vmmov %vm2601_vm0  ;;  %827 = vst [vmem:[#allocation2 + $0x8] sm:$0x7] %v803_v50  ;;  %v1343_v8 = vadd.f32 %v1342_v30, %v2430_v43  ;;  %v1330_v63 = vld [vmem:[#allocation2 + $0xa8] sm:$0x7]  ;;  %v771_v0 = vsel %vm2157_vm4, %v2382_v11, 0.0  ;;  %v1490_v11 = vadd.f32 %v1489_v44, %v1488_v61 }
  0x8c   : > { %v1431_v36 = vsel %vm2605_vm3, %v1400_v13, 0.0  ;;  %v1426_v60 = vadd.f32 %v1425_v1, %v1424_v58  ;;  %v1331_v54 = vld [vmem:[#allocation2 + $0x68] sm:$0x7]  ;;  %vm2613_vm8 = vmmov %vm2601_vm0  ;;  %v1463_v19 = vld [vmem:[#allocation4 + $0x60] sm:$0x7]  ;;  %vm1373_vm2 = vcmask 7168  }
  0x8d   : > { %v1332_v49 = vld [vmem:[#allocation2 + $0x30] sm:$0x7]  ;;  %v1344_v22 = vadd.f32 %v1343_v8, %v763_v10  ;;  %v1356_v37 = vsel %vm2613_vm8, %v1330_v63, 0.0  ;;  %vm2614_vm11 = vmmov %vm2601_vm0  ;;  %v1347_v10 = vadd.f32 %v765_v23, %v764_v40  ;;  %v2625_v50 = vld [vmem:[#allocation12_spill] sm:$0xff]  ;;  %vm1437_vm13 = vcmask 15368  }
  0x8e   : > { %v1428_v59 = vadd.f32 %v1427_v46, %v1426_v60  ;;  %v1333_v3 = vld [vmem:[#allocation2 + $0x58] sm:$0x7]  ;;  %v1357_v6 = vsel %vm2614_vm11, %v1331_v54, 0.0  ;;  %vm2615_vm5 = vmmov %vm2601_vm0  ;;  %vm1501_vm7 = vcmask 23568   ;;  %vm1376_vm8 = vcmask 2048  }
  0x8f   : > { %v1334_v20 = vld [vmem:[#allocation2 + $0x80] sm:$0x7]  ;;  %v1358_v57 = vadd.f32 %v1357_v6, %v1356_v37  ;;  %v1359_v21 = vsel %vm2615_vm5, %v1332_v49, 0.0  ;;  %vm2616_vm4 = vmmov %vm2601_vm0  ;;  %1345 = vadd.xlane.f32.xlu0 %v1344_v22  ;;  %v1348_v34 = vadd.f32 %v1347_v10, %v766_v51  ;;  %vm1440_vm11 = vcmask 10248  }
  0x90   : > { %v1430_v43 = vadd.f32 %v1429_v24, %v1428_v59  ;;  %v1433_v31 = vsel %vm2616_vm4, %v1401_v17, 0.0  ;;  %vm2617_vm14 = vmmov %vm2601_vm0  ;;  %v1335_v25 = vld [vmem:[#allocation2 + $0xb8] sm:$0x7]  ;;  %vm1504_vm5 = vcmask 18448  }
  0x91   : > { %v1361_v55 = vsel %vm2617_vm14, %v1333_v3, 0.0  ;;  %v1360_v39 = vadd.f32 %v1359_v21, %v1358_v57  ;;  %vm2618_vm10 = vmmov %vm2601_vm0  ;;  %v1336_v42 = vld [vmem:[#allocation2 + $0x20] sm:$0x7]  ;;  %v1365_v29 = vsel %vm2601_vm0, %v1335_v25, 0.0  ;;  %v1349_v45 = vadd.f32 %v1348_v34, %v767_v18 }
  0x92   : > { %v1432_v28 = vadd.f32 %v1431_v36, %v1430_v43  ;;  %v1491_v62 = vsel %vm2618_vm10, %v1462_v7, 0.0  ;;  %vm2619_vm15 = vmmov %vm2601_vm0  ;;  %v1337_v13 = vld [vmem:[#allocation2 + $0x8] sm:$0x7]  ;;  %v1465_v36 = vld [vmem:[#allocation4 + $0x80] sm:$0x7] }
  0x93   : > { %v1363_v32 = vsel %vm2619_vm15, %v1334_v20, 0.0  ;;  %v1362_v9 = vadd.f32 %v1361_v55, %v1360_v39  ;;  %v1492_v26 = vadd.f32 %v1491_v62, %v1490_v11  ;;  %vm2620_vm12 = vmmov %vm2601_vm0  ;;  %v1350_v61 = vadd.f32 %v1349_v45, %v768_v14 }
  0x94   : > { %v1434_v5 = vadd.f32 %v1433_v31, %v1432_v28  ;;  %v1493_v56 = vsel %vm2620_vm12, %v1463_v19, 0.0  ;;  %vm2621_vm9 = vmmov %vm2601_vm0 }
  0x95   : > { %v1364_v52 = vadd.f32 %v1363_v32, %v1362_v9  ;;  %v1367_v44 = vsel %vm2621_vm9, %v1336_v42, 0.0  ;;  %vm2622_vm6 = vmmov %vm2601_vm0  ;;  %v1494_v38 = vadd.f32 %v1493_v56, %v1492_v26  ;;  %v1351_v24 = vadd.f32 %v1350_v61, %v769_v15 }
  0x96   : > { %1435 = vadd.xlane.f32.xlu1 %v1434_v5  ;;  %v1369_v48 = vsel %vm2622_vm6, %v1337_v13, 0.0  ;;  %vm2623_vm3 = vmmov %vm2601_vm0 }
  0x97   : > { %v1366_v12 = vadd.f32 %v1365_v29, %v1364_v52  ;;  %v1495_v46 = vsel %vm2623_vm3, %v1464_v27, 0.0  ;;  %v1352_v35 = vadd.f32 %v1351_v24, %v770_v16  ;;  %vm2624_vm1 = vmmov %vm2601_vm0 }
  0x98   : > { %v1496_v4 = vadd.f32 %v1495_v46, %v1494_v38  ;;  %v1497_v47 = vsel %vm2624_vm1, %v1465_v36, 0.0 }
  0x99   : > { %v1368_v1 = vadd.f32 %v1367_v44, %v1366_v12  ;;  %v1353_v58 = vadd.f32 %v1352_v35, %v771_v0 }
  0x9a   : > { %v1498_v41 = vadd.f32 %v1497_v47, %v1496_v4 }
  0x9b   : > { %v1370_v53 = vadd.f32 %v1369_v48, %v1368_v1  ;;  %1354 = vadd.xlane.f32.xlu0 %v1353_v58 }
  0x9d   : > { %1371 = vadd.xlane.f32.xlu1 %v1370_v53 }
  0x9f   : > { %1499 = vadd.xlane.f32.xlu0 %v1498_v41 }
  0xa1   : > { %1482 = vadd.xlane.f32.xlu1 %v2625_v50 }
  0xb2   : > { %v1474_v2 = vpop.xlane.xlu0 %1473 }
 0x10a   : > { %v1419_v40 = vpop.xlane.xlu0 %1418 }
 0x10b   : > { %v1410_v30 = vpop.xlane.xlu1 %1409 }
 0x118   : > { %v1346_v23 = vpop.xlane.xlu0 %1345 }
 0x119   : > { %1374 = vst.msk [vmem:[%s235_s24] sm:$0xff] %vm1373_vm2, %v1346_v23 }
 0x11a   : > { %1438 = vst.msk [vmem:[%s235_s24] sm:$0xff] %vm1437_vm13, %v1410_v30 }
 0x11b   : > { %1502 = vst.msk [vmem:[%s235_s24] sm:$0xff] %vm1501_vm7, %v1474_v2 }
 0x11f   : > { %v1436_v51 = vpop.xlane.xlu1 %1435 }
 0x124   : > { %v1355_v60 = vpop.xlane.xlu0 %1354 }
 0x125   : > { %1375 = vst.msk [vmem:[%s235_s24 + $0x8] sm:$0xff] %vm1373_vm2, %v1355_v60 }
 0x126   : > { %v1372_v18 = vpop.xlane.xlu1 %1371  ;;  %1439 = vst.msk [vmem:[%s235_s24 + $0x8] sm:$0xff] %vm1437_vm13, %v1419_v40 }
 0x127   : > { %1377 = vst.msk [vmem:[%s235_s24 + $0x10] sm:$0x7] %vm1376_vm8, %v1372_v18 }
 0x128   : > { %1441 = vst.msk [vmem:[%s235_s24 + $0x10] sm:$0x7] %vm1440_vm11, %v1436_v51  ;;  %v1500_v15 = vpop.xlane.xlu0 %1499 }
 0x129   : > { %1505 = vst.msk [vmem:[%s235_s24 + $0x10] sm:$0x7] %vm1504_vm5, %v1500_v15 }
 0x12a   : > { %v1483_v14 = vpop.xlane.xlu1 %1482 }
 0x12b   : > { %1503 = vst.msk [vmem:[%s235_s24 + $0x8] sm:$0xff] %vm1501_vm7, %v1483_v14 }
 0x12c PF: > { %s12_s11 = sadd.s32 1, %s1784_s11   ;;  %s2626_s9 = smov %s1780_s10 }
 0x12d   : > { %p9_p5 = scmp.ge.s32.totalorder %s12_s11, 4   ;;  %s2627_s10 = smov %s2629_s12 }
 0x12f   :  { %11 = sbr.rel (!%p9_p5) target bundleno = 2 (0x2), region = 77 }

</bundles_post_ra>
